<compile_context>
chip_gen: v5e
topology: v5e:2x2
jax: 0.10.0
libtpu: 0.0.40
codegen_flags: <defaults>
</compile_context>

<pallas_src>
import functools

import jax
import jax.numpy as jnp
from jax.experimental import pallas as pl
from jax.experimental.pallas import tpu as pltpu


def _round_up(x, m):
    return ((x + m - 1) // m) * m


# ---------------------------------------------------------------------------
# 2-D kernels: grid = (C_tiles, N_tiles); axis 1 (batch) is the reduction axis.
# ---------------------------------------------------------------------------
def _gen_kernel_2d(fake_ref, out_ref, acc_ref, *, scale):
    k = pl.program_id(1)

    @pl.when(k == 0)
    def _():
        acc_ref[...] = jnp.zeros_like(acc_ref)

    # Negation folded into the finalize scale; streaming path is a pure sum.
    acc_ref[...] += jnp.sum(fake_ref[...].astype(jnp.float32), axis=0, keepdims=True)

    @pl.when(k == pl.num_programs(1) - 1)
    def _():
        out_ref[...] = (acc_ref[...] * (-scale)).astype(out_ref.dtype)


def _disc_kernel_2d(real_ref, fake_ref, out_ref, acc_ref, *, scale):
    k = pl.program_id(1)

    @pl.when(k == 0)
    def _():
        acc_ref[...] = jnp.zeros_like(acc_ref)

    real = real_ref[...].astype(jnp.float32)
    fake = fake_ref[...].astype(jnp.float32)
    loss = jnp.maximum(1.0 - real, 0.0) + jnp.maximum(1.0 + fake, 0.0)
    acc_ref[...] += jnp.sum(loss, axis=0, keepdims=True)

    @pl.when(k == pl.num_programs(1) - 1)
    def _():
        out_ref[...] = (acc_ref[...] * scale).astype(out_ref.dtype)


# ---------------------------------------------------------------------------
# Lane-dense 1-D kernels (C == 1): the (N,) vector is repacked to (rows, 128).
# Padded rows use neutral values so they sum to zero.
# ---------------------------------------------------------------------------
def _gen_kernel_1d(fake_ref, out_ref, acc_ref, *, scale):
    k = pl.program_id(0)

    @pl.when(k == 0)
    def _():
        acc_ref[...] = jnp.zeros_like(acc_ref)

    acc_ref[...] += jnp.sum(fake_ref[...].astype(jnp.float32), axis=0, keepdims=True)

    @pl.when(k == pl.num_programs(0) - 1)
    def _():
        out_ref[...] = (jnp.sum(acc_ref[...], keepdims=True) * (-scale)).astype(
            out_ref.dtype
        )


def _disc_kernel_1d(real_ref, fake_ref, out_ref, acc_ref, *, scale):
    k = pl.program_id(0)

    @pl.when(k == 0)
    def _():
        acc_ref[...] = jnp.zeros_like(acc_ref)

    real = real_ref[...].astype(jnp.float32)
    fake = fake_ref[...].astype(jnp.float32)
    loss = jnp.maximum(1.0 - real, 0.0) + jnp.maximum(1.0 + fake, 0.0)
    acc_ref[...] += jnp.sum(loss, axis=0, keepdims=True)

    @pl.when(k == pl.num_programs(0) - 1)
    def _():
        out_ref[...] = (jnp.sum(acc_ref[...], keepdims=True) * scale).astype(
            out_ref.dtype
        )


# ---------------------------------------------------------------------------
# Launchers
# ---------------------------------------------------------------------------
def _launch_1d(fake1d, real1d, mode, scale, out_dtype):
    n = fake1d.shape[0]
    rows0 = pl.cdiv(n, 128)
    tr = min(_round_up(rows0, 8), 512)            # sublane tile, (8,128)-aligned
    n_pad = _round_up(n, tr * 128)
    rows = n_pad // 128
    nsteps = rows // tr

    if mode == "generator":
        fake = jnp.pad(fake1d, (0, n_pad - n), constant_values=0.0).reshape(rows, 128)
        kernel = functools.partial(_gen_kernel_1d, scale=scale)
        ins = (fake,)
        in_specs = [pl.BlockSpec((tr, 128), lambda k: (k, 0))]
    else:
        real = jnp.pad(real1d, (0, n_pad - n), constant_values=1.0).reshape(rows, 128)
        fake = jnp.pad(fake1d, (0, n_pad - n), constant_values=-1.0).reshape(rows, 128)
        kernel = functools.partial(_disc_kernel_1d, scale=scale)
        ins = (real, fake)
        in_specs = [
            pl.BlockSpec((tr, 128), lambda k: (k, 0)),
            pl.BlockSpec((tr, 128), lambda k: (k, 0)),
        ]

    return pl.pallas_call(
        kernel,
        grid=(nsteps,),
        in_specs=in_specs,
        out_specs=pl.BlockSpec((1, 1), lambda k: (0, 0)),
        out_shape=jax.ShapeDtypeStruct((1, 1), out_dtype),
        scratch_shapes=[pltpu.VMEM((1, 128), jnp.float32)],
        compiler_params=pltpu.CompilerParams(dimension_semantics=("arbitrary",)),
    )(*ins)


def _launch_2d(fake2d, real2d, mode, scale, out_dtype):
    n, c = fake2d.shape
    tc = min(_round_up(c, 128), 2048)             # lane tile
    c_pad = _round_up(c, tc)
    tn = min(_round_up(n, 8), 512)                # sublane (batch) tile, v7x-safe
    n_pad = _round_up(n, tn)
    nsteps = n_pad // tn

    if mode == "generator":
        fake = jnp.pad(fake2d, ((0, n_pad - n), (0, c_pad - c)), constant_values=0.0)
        kernel = functools.partial(_gen_kernel_2d, scale=scale)
        ins = (fake,)
        in_specs = [pl.BlockSpec((tn, tc), lambda j, k: (k, j))]
    else:
        real = jnp.pad(real2d, ((0, n_pad - n), (0, c_pad - c)), constant_values=1.0)
        fake = jnp.pad(fake2d, ((0, n_pad - n), (0, c_pad - c)), constant_values=-1.0)
        kernel = functools.partial(_disc_kernel_2d, scale=scale)
        ins = (real, fake)
        in_specs = [
            pl.BlockSpec((tn, tc), lambda j, k: (k, j)),
            pl.BlockSpec((tn, tc), lambda j, k: (k, j)),
        ]

    result = pl.pallas_call(
        kernel,
        grid=(c_pad // tc, nsteps),               # reduction axis last
        in_specs=in_specs,
        out_specs=pl.BlockSpec((1, tc), lambda j, k: (0, j)),
        out_shape=jax.ShapeDtypeStruct((1, c_pad), out_dtype),
        scratch_shapes=[pltpu.VMEM((1, tc), jnp.float32)],
        compiler_params=pltpu.CompilerParams(
            dimension_semantics=("parallel", "arbitrary")
        ),
    )(*ins)
    return result[:, :c]


# ---------------------------------------------------------------------------
# Wrapper
# ---------------------------------------------------------------------------
def hinge_loss(fake_logits, mode, real_logits=None, reduction="mean"):
    assert mode in ("generator", "discriminator")
    assert reduction in ("sum", "mean")

    orig_shape = fake_logits.shape
    n = orig_shape[0]
    trailing = orig_shape[1:]
    c = 1
    for d in trailing:
        c *= d

    scale = (1.0 / n) if reduction == "mean" else 1.0
    out_dtype = fake_logits.dtype

    fake2d = fake_logits.reshape(n, c)
    if mode == "discriminator":
        assert real_logits is not None
        assert real_logits.shape == fake_logits.shape
        real2d = real_logits.reshape(n, c)
    else:
        real2d = None

    if c == 1:
        # Lane-dense path for the typical GAN discriminator head.
        fake1d = fake2d.reshape(n)
        real1d = real2d.reshape(n) if real2d is not None else None
        result = _launch_1d(fake1d, real1d, mode, scale, out_dtype)   # (1, 1)
    else:
        result = _launch_2d(fake2d, real2d, mode, scale, out_dtype)   # (1, c)

    # torch's mean(0)/sum(0) removes only dim 0 and keeps the trailing dims.
    return result.reshape(trailing)


# ---------------------------------------------------------------------------
# Reference (plain JAX) for sanity check
# ---------------------------------------------------------------------------
def _reference(fake_logits, mode, real_logits=None, reduction="mean"):
    if mode == "generator":
        loss = -fake_logits
    else:
        loss = jnp.maximum(1.0 - real_logits, 0.0) + jnp.maximum(1.0 + fake_logits, 0.0)
    return loss.mean(axis=0) if reduction == "mean" else loss.sum(axis=0)


if __name__ == "__main__":
    key = jax.random.PRNGKey(0)
    k1, k2, k3, k4, k5, k6 = jax.random.split(key, 6)

    # Typical GAN discriminator head: one logit per example (lane-dense path).
    fake1 = jax.random.normal(k1, (8,), dtype=jnp.float32)
    real1 = jax.random.normal(k2, (8,), dtype=jnp.float32)
    # Multi-column logits (2-D streaming path).
    fake2 = jax.random.normal(k3, (8, 4), dtype=jnp.float32)
    real2 = jax.random.normal(k4, (8, 4), dtype=jnp.float32)
    # Higher-rank logits (trailing dims preserved by the reduction).
    fake3 = jax.random.normal(k5, (8, 2, 3), dtype=jnp.float32)
    real3 = jax.random.normal(k6, (8, 2, 3), dtype=jnp.float32)

    ok = True
    for fk, rl in ((fake1, real1), (fake2, real2), (fake3, real3)):
        for reduction in ("mean", "sum"):
            g = hinge_loss(fk, "generator", reduction=reduction)
            jax.block_until_ready(g)
            g_ref = _reference(fk, "generator", reduction=reduction)
            ok &= g.shape == g_ref.shape
            ok &= bool(jnp.allclose(g, g_ref, atol=1e-5, rtol=1e-5))

            d = hinge_loss(fk, "discriminator", real_logits=rl, reduction=reduction)
            jax.block_until_ready(d)
            d_ref = _reference(fk, "discriminator", real_logits=rl, reduction=reduction)
            ok &= d.shape == d_ref.shape
            ok &= bool(jnp.allclose(d, d_ref, atol=1e-5, rtol=1e-5))

    if ok:
        print("KERNEL_OK")
    else:
        raise SystemExit("mismatch vs reference")
</pallas_src>

<mosaic_0001>
module attributes {stable_mosaic.version = 11 : i64} {
  func.func @_gen_kernel_1d(%arg0: i32, %arg1: memref<8x128xf32, #tpu.memory_space<vmem>>, %arg2: memref<1x1xf32, #tpu.memory_space<vmem>>, %arg3: memref<1x128xf32, #tpu.memory_space<vmem>>) attributes {dimension_semantics = [#tpu.dimension_semantics<arbitrary>], iteration_bounds = array<i64: 1>, scalar_prefetch = 0 : i64, scratch_operands = 1 : i64, tpu.core_type = #tpu.core_type<tc>, window_params = [{transform_indices = @transform_0, window_bounds = array<i64: 8, 128>}, {pipeline_mode = #tpu.pipeline_mode<synchronous>, transform_indices = @transform_1, window_bounds = array<i64: 1, 1>}]} {
    %c0_i32 = arith.constant 0 : i32
    %0 = arith.cmpi eq, %arg0, %c0_i32 : i32
    %1 = arith.extui %0 : i1 to i32
    %c0_i32_0 = arith.constant 0 : i32
    %2 = arith.cmpi ne, %1, %c0_i32_0 : i32
    scf.if %2 {
      %cst_8 = arith.constant 0.000000e+00 : f32
      %12 = vector.broadcast %cst_8 : f32 to vector<1x128xf32>
      %c0_9 = arith.constant 0 : index
      %c0_10 = arith.constant 0 : index
      %13 = vector.load %arg3[%c0_9, %c0_10] : memref<1x128xf32, #tpu.memory_space<vmem>>, vector<1x128xf32>
      tpu.vector_store %arg3[%c0_9, %c0_10], %12 {strides = array<i32>} : memref<1x128xf32, #tpu.memory_space<vmem>>, vector<1x128xf32>,
    } else {
    }
    %c0 = arith.constant 0 : index
    %c0_1 = arith.constant 0 : index
    %3 = vector.load %arg3[%c0, %c0_1] : memref<1x128xf32, #tpu.memory_space<vmem>>, vector<1x128xf32>
    %c0_2 = arith.constant 0 : index
    %c0_3 = arith.constant 0 : index
    %4 = vector.load %arg1[%c0_2, %c0_3] : memref<8x128xf32, #tpu.memory_space<vmem>>, vector<8x128xf32>
    %cst = arith.constant dense<0.000000e+00> : vector<128xf32>
    %5 = vector.multi_reduction <add>, %4, %cst [0] : vector<8x128xf32> to vector<128xf32>
    %6 = vector.shape_cast %5 : vector<128xf32> to vector<1x128xf32>
    %7 = arith.addf %3, %6 : vector<1x128xf32>
    %c0_4 = arith.constant 0 : index
    %c0_5 = arith.constant 0 : index
    %8 = vector.load %arg3[%c0_4, %c0_5] : memref<1x128xf32, #tpu.memory_space<vmem>>, vector<1x128xf32>
    tpu.vector_store %arg3[%c0_4, %c0_5], %7 {strides = array<i32>} : memref<1x128xf32, #tpu.memory_space<vmem>>, vector<1x128xf32>,
    %c0_i32_6 = arith.constant 0 : i32
    %9 = arith.cmpi eq, %arg0, %c0_i32_6 : i32
    %10 = arith.extui %9 : i1 to i32
    %c0_i32_7 = arith.constant 0 : i32
    %11 = arith.cmpi ne, %10, %c0_i32_7 : i32
    scf.if %11 {
      %c0_8 = arith.constant 0 : index
      %c0_9 = arith.constant 0 : index
      %12 = vector.load %arg3[%c0_8, %c0_9] : memref<1x128xf32, #tpu.memory_space<vmem>>, vector<1x128xf32>
      %13 = vector.shape_cast %12 : vector<1x128xf32> to vector<1x1x128xf32>
      %cst_10 = arith.constant dense<0.000000e+00> : vector<1xf32>
      %14 = vector.multi_reduction <add>, %13, %cst_10 [1, 2] : vector<1x1x128xf32> to vector<1xf32>
      %15 = vector.shape_cast %14 : vector<1xf32> to vector<1x1x1xf32>
      %16 = vector.extract %15[0, 0, 0] : f32 from vector<1x1x1xf32>
      %17 = vector.broadcast %16 : f32 to vector<1x1xf32>
      %cst_11 = arith.constant -1.250000e-01 : f32
      %18 = vector.broadcast %cst_11 : f32 to vector<1x1xf32>
      %19 = arith.mulf %17, %18 : vector<1x1xf32>
      %c0_12 = arith.constant 0 : index
      %c0_13 = arith.constant 0 : index
      %20 = vector.load %arg2[%c0_12, %c0_13] : memref<1x1xf32, #tpu.memory_space<vmem>>, vector<1x1xf32>
      tpu.vector_store %arg2[%c0_12, %c0_13], %19 {strides = array<i32>} : memref<1x1xf32, #tpu.memory_space<vmem>>, vector<1x1xf32>,
    } else {
    }
    return
  }
  func.func @transform_0(%arg0: i32) -> (i32, i32) {
    %c0_i32 = arith.constant 0 : i32
    %c0_i32_0 = arith.constant 0 : i32
    return %arg0, %c0_i32 : i32, i32
  }
  func.func @transform_1(%arg0: i32) -> (i32, i32) {
    %c0_i32 = arith.constant 0 : i32
    %c0_i32_0 = arith.constant 0 : i32
    %c0_i32_1 = arith.constant 0 : i32
    return %c0_i32, %c0_i32_0 : i32, i32
  }
}

</mosaic_0001>

<bundles_post_ra>
// kernel: tpu_custom_call.1
= control target key start
LH: loop header
LB: loop body
LE: loop exit
PB: predicated region body
PF: predicated region fallthrough
CT: control target
= control target key end

     0   :  { %6 = vsyncpa [#allocation4], 0  ;;  %s150_s0 = inlined_call_operand.hbm [shape: f32[8,128], index: 0, kind: input, shape index: {}]   ;;  %s151_s1 = inlined_call_operand.hbm [shape: f32[1,1], index: 1, kind: output, shape index: {}]  }
   0x1   :  { %7 = vsyncpa [#allocation5], 0  ;;  %s13_s8 = sshll.u32 %s150_s0, 4  ;;  %s131_s9 = smov [#allocation3]   ;;  %s14_s8 = int_to_ptr.hbm [resolvable:$true] %s13_s8 }
   0x2   :  { %s15_s10 = sshll.u32 %s131_s9, 4  ;;  %s16_s10 = int_to_ptr.vmem [resolvable:$true] %s15_s10 }
   0x3   :  { %18 = dma.hbm_to_vmem [thread:$0]  %s14_s8, 128, %s16_s10, [#allocation4]  }
   0x4   :  { %127 = dma.done.wait [#allocation4], 128  }
   0x5   :  { %128 = vsyncadd [#allocation4], 4294967168  ;;  %v132_v0 = vmov 0.0   ;;  %v29_v1 = vld [vmem:[#allocation3] sm:$0xff]  ;;  %vm42_vm0 = vcmask 1040384   ;;  %s133_s0 = smov [#allocation6]  }
   0x6   :  { %27 = vst [vmem:[#allocation2] sm:$0x1] %v132_v0  ;;  %v30_v2 = vrot.slane %v29_v1, 4  ;;  %s62_s11 = sshll.u32 %s133_s0, 4  ;;  %s64_s14 = sshll.u32 %s151_s1, 4  ;;  %vm55_vm1 = vcmask 0   ;;  %s63_s11 = int_to_ptr.vmem [resolvable:$true] %s62_s11  ;;  %s65_s14 = int_to_ptr.hbm [resolvable:$true] %s64_s14 }
   0x8   :  { %v31_v3 = vadd.f32 %v30_v2, %v29_v1 }
   0xa   :  { %v32_v4 = vrot.slane %v31_v3, 2 }
   0xc   :  { %v33_v5 = vadd.f32 %v32_v4, %v31_v3 }
   0xd   :  { %v28_v7 = vld [vmem:[#allocation2] sm:$0x1] }
   0xe   :  { %v34_v6 = vrot.slane %v33_v5, 1 }
  0x10   :  { %v35_v8 = vadd.f32 %v34_v6, %v33_v5 }
  0x12   :  { %v36_v9 = vadd.f32 %v35_v8, %v28_v7 }
  0x14   :  { %37 = vst [vmem:[#allocation2] sm:$0x1] %v36_v9 }
  0x1b   :  { %v41_v10 = vld [vmem:[#allocation2] sm:$0x1] }
  0x1c   :  { %v43_v11 = vsel %vm42_vm0, %v41_v10, 0.0 }
  0x1d   :  { %44 = vadd.xlane.f32.xlu0 %v43_v11 }
  0x90   :  { %v45_v12 = vpop.xlane.xlu0 %44 }
  0x91   :  { %v46_v13 = vrot.slane %v45_v12, 4 }
  0x93   :  { %v47_v14 = vadd.f32 %v46_v13, %v45_v12 }
  0x95   :  { %v48_v15 = vrot.slane %v47_v14, 2 }
  0x97   :  { %v49_v16 = vadd.f32 %v48_v15, %v47_v14 }
  0x99   :  { %v50_v17 = vrot.slane %v49_v16, 1 }
  0x9b   :  { %v51_v18 = vadd.f32 %v50_v17, %v49_v16 }
  0x9d   :  { %74 = vpush %v51_v18 }
  0xce   :  { %s75_s15 = spop %74 }
  0xcf   :  { %v53_v19 = vstv %s75_s15 }
  0xd0   :  { %v54_v20 = vmul.f32 -0.125, %v53_v19 }
  0xd2   :  { %56 = vst.msk [vmem:[#allocation6] sm:$0x1] %vm55_vm1, %v54_v20 }
  0xd3   :  { %67 = dma.vmem_to_hbm [thread:$0]  %s63_s11, 16, %s65_s14, [#allocation5]  }
  0xd4   :  { %129 = dma.done.wait [#allocation5], 16  }
  0xd5   :  { %130 = vsyncadd [#allocation5], 4294967280 }
  0xd6   :  { %72 = vsyncpa [#allocation4], 1 }
  0xd7   :  { %73 = vsyncpa [#allocation5], 1 }

</bundles_post_ra>
